<compile_context>
chip_gen: v7x
topology: tpu7x:2x2x1
jax: 0.10.0
libtpu: 0.0.40
codegen_flags: <defaults>
</compile_context>

<pallas_src>
import jax
import jax.numpy as jnp
from jax.experimental import pallas as pl
from jax.experimental.pallas import tpu as pltpu


_N_ROWS = 17  # 4 layers * (2 fc rows + 2 tanh rows) + 1 fc5 row


def _disk_classifier_kernel(params_ref, x_ref, out_ref):
    # params_ref: (27,) f32 in SMEM (scalar prefetch)
    #   layer l in 0..3: W[0,0],W[0,1],W[1,0],W[1,1],b[0],b[1] at 6*l .. 6*l+5
    #   fc5:             W[0,0],W[0,1],b[0]                   at 24, 25, 26
    # x_ref:   (2, 8, tn/8)   input tile, batch packed on (sublane, lane)
    # out_ref: (17, 8, tn/8)  packed [fc1(2) tanh(2) fc2(2) tanh(2) fc3(2)
    #                                 tanh(2) fc4(2) tanh(2) fc5(1)]
    # Read all 27 scalars once at the top (keeps scalar->vector broadcasts
    # hoisted out of the unrolled layer loop).
    p = [params_ref[i] for i in range(27)]

    a0 = x_ref[0]  # (8, tn/8) full-vreg slabs
    a1 = x_ref[1]

    for layer in range(4):  # unrolled at trace time
        off = 6 * layer
        w00, w01, w10, w11, b0, b1 = p[off:off + 6]

        # y_j = W[j,0]*x0 + W[j,1]*x1 + b[j]  (scalar-broadcast VPU math)
        h0 = w00 * a0 + w01 * a1 + b0
        h1 = w10 * a0 + w11 * a1 + b1

        r = 4 * layer
        out_ref[r + 0] = h0
        out_ref[r + 1] = h1

        a0 = jnp.tanh(h0)  # EUP
        a1 = jnp.tanh(h1)
        out_ref[r + 2] = a0
        out_ref[r + 3] = a1

    # fc5: Linear(2, 1)
    out_ref[16] = p[24] * a0 + p[25] * a1 + p[26]


def disk_classifier_forward(x, layers, *, tn=8192, core_parallel=False):
    """Forward pass of DiskClassifier2D.

    x:      (N, 2) input points.
    layers: list of 5 (weight, bias) pairs with nn.Linear shapes
            [(2,2),(2,)], ..., [(1,2),(1,)].
    tn:     batch tile (columns per grid step), multiple of 1024.  Keep
            <= ~128K so double-buffered tiles stay inside v7x's 64 MiB VMEM.
    core_parallel: use pltpu.CORE_PARALLEL on the batch axis (2-TC chips,
            e.g. v7x).  Default False = plain "parallel" (safe everywhere).

    Returns the 10-element list [input, fc1, tanh, fc2, tanh, fc3, tanh,
    fc4, tanh, fc5] matching the PyTorch module.
    """
    assert tn % 1024 == 0, "tn must be a multiple of 1024 (sublane packing)"
    assert tn <= 131072, "cap tn so double-buffered tiles fit v7x VMEM"
    n = x.shape[0]
    n_pad = pl.cdiv(n, tn) * tn
    n_tiles = n_pad // tn
    k = tn // 8  # lane width per slab (multiple of 128)

    x32 = x.astype(jnp.float32)
    if n_pad != n:
        x32 = jnp.pad(x32, ((0, n_pad - n), (0, 0)))
    # One small transpose (2*N*4 bytes), then a free row-major reshape that
    # packs each tile's batch columns into full (8, tn/8) vreg slabs.
    x_in = x32.T.reshape(2, n_tiles, 8, k)

    # Flatten all parameters into one f32[27] array for scalar prefetch.
    params = jnp.concatenate(
        [jnp.concatenate([w.reshape(-1), b.reshape(-1)]) for w, b in layers]
    ).astype(jnp.float32)
    assert params.shape == (27,)

    # Only raise the scoped-VMEM limit when a large tile actually needs it
    # (double-buffered in+out f32 tiles ~= 304*tn bytes).
    vmem_needed = 2 * 4 * (2 + _N_ROWS) * tn
    cp_kwargs = {}
    if vmem_needed > (12 << 20):
        cp_kwargs["vmem_limit_bytes"] = min(vmem_needed + (4 << 20), 48 << 20)
    dim_sem = (pltpu.CORE_PARALLEL,) if core_parallel else ("parallel",)

    packed4 = pl.pallas_call(
        _disk_classifier_kernel,
        out_shape=jax.ShapeDtypeStruct((_N_ROWS, n_tiles, 8, k), jnp.float32),
        grid_spec=pltpu.PrefetchScalarGridSpec(
            num_scalar_prefetch=1,           # params -> SMEM before the grid
            grid=(n_tiles,),
            in_specs=[
                # (2, 8, tn/8) slab per step; grid dim squeezed out.
                pl.BlockSpec((2, None, 8, k), lambda i, params: (0, i, 0, 0)),
            ],
            out_specs=pl.BlockSpec(
                (_N_ROWS, None, 8, k), lambda i, params: (0, i, 0, 0)),
        ),
        compiler_params=pltpu.CompilerParams(
            dimension_semantics=dim_sem, **cp_kwargs),
        cost_estimate=pl.CostEstimate(
            flops=36 * n_pad,                        # 4*(4 mul+4 add) + (2+2)
            transcendentals=8 * n_pad,               # 8 tanh per element
            bytes_accessed=(2 + _N_ROWS) * 4 * n_pad),
    )(params, x_in)

    # Free reshape back to (17, N); ONE transpose pass to batch-major, then
    # cheap column slices (pad columns hold bias/tanh(bias) junk -> slice :n).
    slab = packed4.reshape(_N_ROWS, n_pad).T[:n]     # (n, 17)

    outs = [x]
    for li in range(4):
        outs.append(slab[:, 4 * li + 0:4 * li + 2])  # fc_{li+1}(x)
        outs.append(slab[:, 4 * li + 2:4 * li + 4])  # tanh(fc_{li+1}(x))
    outs.append(slab[:, 16:17])                      # fc5
    return outs


def _reference_forward(x, layers):
    outs = [x]
    a = x
    for w, b in layers[:-1]:
        a = a @ w.T + b
        outs.append(a)
        a = jnp.tanh(a)
        outs.append(a)
    w5, b5 = layers[-1]
    outs.append(a @ w5.T + b5)
    return outs


if __name__ == "__main__":
    key = jax.random.PRNGKey(0)
    keys = jax.random.split(key, 11)

    # Batch of 2-D points; deliberately not a tile multiple to exercise the
    # padding path.  tn=1024 -> 2 grid steps with the 2000-point batch.
    batch = 2000
    x = jax.random.normal(keys[0], (batch, 2), dtype=jnp.float32)

    def init_linear(kw, kb, out_f, in_f):
        bound = 1.0 / (in_f ** 0.5)
        w = jax.random.uniform(kw, (out_f, in_f), jnp.float32, -bound, bound)
        b = jax.random.uniform(kb, (out_f,), jnp.float32, -bound, bound)
        return w, b

    shapes = [(2, 2), (2, 2), (2, 2), (2, 2), (1, 2)]
    layers = []
    ki = 1
    for out_f, in_f in shapes:
        layers.append(init_linear(keys[ki], keys[ki + 1], out_f, in_f))
        ki += 2

    outs = disk_classifier_forward(x, layers, tn=1024)
    outs = jax.block_until_ready(outs)

    refs = _reference_forward(x, layers)
    assert len(outs) == len(refs) == 10
    for o, r in zip(outs, refs):
        assert o.shape == r.shape, (o.shape, r.shape)
        assert jnp.allclose(o, r, atol=1e-5, rtol=1e-5)

    print("KERNEL_OK")
</pallas_src>

<mosaic_0001>
module attributes {stable_mosaic.version = 11 : i64} {
  func.func @_disk_classifier_kernel(%arg0: i32, %arg1: memref<27xf32, #tpu.memory_space<smem>>, %arg2: memref<2x1x8x128xf32, #tpu.memory_space<vmem>>, %arg3: memref<17x1x8x128xf32, #tpu.memory_space<vmem>>) attributes {dimension_semantics = [#tpu.dimension_semantics<parallel>], iteration_bounds = array<i64: 2>, scalar_prefetch = 1 : i64, scratch_operands = 0 : i64, tpu.core_type = #tpu.core_type<tc>, window_params = [{transform_indices = @transform_0, window_bounds = array<i64: 2, 1, 8, 128>}, {transform_indices = @transform_1, window_bounds = array<i64: 17, 1, 8, 128>}]} {
    %c0 = arith.constant 0 : index
    %0 = memref.load %arg1[%c0] : memref<27xf32, #tpu.memory_space<smem>>
    %c1 = arith.constant 1 : index
    %1 = memref.load %arg1[%c1] : memref<27xf32, #tpu.memory_space<smem>>
    %c2 = arith.constant 2 : index
    %2 = memref.load %arg1[%c2] : memref<27xf32, #tpu.memory_space<smem>>
    %c3 = arith.constant 3 : index
    %3 = memref.load %arg1[%c3] : memref<27xf32, #tpu.memory_space<smem>>
    %c4 = arith.constant 4 : index
    %4 = memref.load %arg1[%c4] : memref<27xf32, #tpu.memory_space<smem>>
    %c5 = arith.constant 5 : index
    %5 = memref.load %arg1[%c5] : memref<27xf32, #tpu.memory_space<smem>>
    %c6 = arith.constant 6 : index
    %6 = memref.load %arg1[%c6] : memref<27xf32, #tpu.memory_space<smem>>
    %c7 = arith.constant 7 : index
    %7 = memref.load %arg1[%c7] : memref<27xf32, #tpu.memory_space<smem>>
    %c8 = arith.constant 8 : index
    %8 = memref.load %arg1[%c8] : memref<27xf32, #tpu.memory_space<smem>>
    %c9 = arith.constant 9 : index
    %9 = memref.load %arg1[%c9] : memref<27xf32, #tpu.memory_space<smem>>
    %c10 = arith.constant 10 : index
    %10 = memref.load %arg1[%c10] : memref<27xf32, #tpu.memory_space<smem>>
    %c11 = arith.constant 11 : index
    %11 = memref.load %arg1[%c11] : memref<27xf32, #tpu.memory_space<smem>>
    %c12 = arith.constant 12 : index
    %12 = memref.load %arg1[%c12] : memref<27xf32, #tpu.memory_space<smem>>
    %c13 = arith.constant 13 : index
    %13 = memref.load %arg1[%c13] : memref<27xf32, #tpu.memory_space<smem>>
    %c14 = arith.constant 14 : index
    %14 = memref.load %arg1[%c14] : memref<27xf32, #tpu.memory_space<smem>>
    %c15 = arith.constant 15 : index
    %15 = memref.load %arg1[%c15] : memref<27xf32, #tpu.memory_space<smem>>
    %c16 = arith.constant 16 : index
    %16 = memref.load %arg1[%c16] : memref<27xf32, #tpu.memory_space<smem>>
    %c17 = arith.constant 17 : index
    %17 = memref.load %arg1[%c17] : memref<27xf32, #tpu.memory_space<smem>>
    %c18 = arith.constant 18 : index
    %18 = memref.load %arg1[%c18] : memref<27xf32, #tpu.memory_space<smem>>
    %c19 = arith.constant 19 : index
    %19 = memref.load %arg1[%c19] : memref<27xf32, #tpu.memory_space<smem>>
    %c20 = arith.constant 20 : index
    %20 = memref.load %arg1[%c20] : memref<27xf32, #tpu.memory_space<smem>>
    %c21 = arith.constant 21 : index
    %21 = memref.load %arg1[%c21] : memref<27xf32, #tpu.memory_space<smem>>
    %c22 = arith.constant 22 : index
    %22 = memref.load %arg1[%c22] : memref<27xf32, #tpu.memory_space<smem>>
    %c23 = arith.constant 23 : index
    %23 = memref.load %arg1[%c23] : memref<27xf32, #tpu.memory_space<smem>>
    %c24 = arith.constant 24 : index
    %24 = memref.load %arg1[%c24] : memref<27xf32, #tpu.memory_space<smem>>
    %c25 = arith.constant 25 : index
    %25 = memref.load %arg1[%c25] : memref<27xf32, #tpu.memory_space<smem>>
    %c26 = arith.constant 26 : index
    %26 = memref.load %arg1[%c26] : memref<27xf32, #tpu.memory_space<smem>>
    %c0_0 = arith.constant 0 : index
    %c0_1 = arith.constant 0 : index
    %c0_2 = arith.constant 0 : index
    %c0_3 = arith.constant 0 : index
    %27 = vector.load %arg2[%c0_0, %c0_1, %c0_2, %c0_3] : memref<2x1x8x128xf32, #tpu.memory_space<vmem>>, vector<1x1x8x128xf32>
    %28 = vector.shape_cast %27 : vector<1x1x8x128xf32> to vector<8x128xf32>
    %c1_4 = arith.constant 1 : index
    %c0_5 = arith.constant 0 : index
    %c0_6 = arith.constant 0 : index
    %c0_7 = arith.constant 0 : index
    %29 = vector.load %arg2[%c1_4, %c0_5, %c0_6, %c0_7] : memref<2x1x8x128xf32, #tpu.memory_space<vmem>>, vector<1x1x8x128xf32>
    %30 = vector.shape_cast %29 : vector<1x1x8x128xf32> to vector<8x128xf32>
    %31 = vector.broadcast %0 : f32 to vector<8x128xf32>
    %32 = arith.mulf %31, %28 : vector<8x128xf32>
    %33 = vector.broadcast %1 : f32 to vector<8x128xf32>
    %34 = arith.mulf %33, %30 : vector<8x128xf32>
    %35 = arith.addf %32, %34 : vector<8x128xf32>
    %36 = vector.broadcast %4 : f32 to vector<8x128xf32>
    %37 = arith.addf %35, %36 : vector<8x128xf32>
    %38 = vector.broadcast %2 : f32 to vector<8x128xf32>
    %39 = arith.mulf %38, %28 : vector<8x128xf32>
    %40 = vector.broadcast %3 : f32 to vector<8x128xf32>
    %41 = arith.mulf %40, %30 : vector<8x128xf32>
    %42 = arith.addf %39, %41 : vector<8x128xf32>
    %43 = vector.broadcast %5 : f32 to vector<8x128xf32>
    %44 = arith.addf %42, %43 : vector<8x128xf32>
    %c0_8 = arith.constant 0 : index
    %c0_9 = arith.constant 0 : index
    %c0_10 = arith.constant 0 : index
    %c0_11 = arith.constant 0 : index
    %45 = vector.load %arg3[%c0_8, %c0_9, %c0_10, %c0_11] : memref<17x1x8x128xf32, #tpu.memory_space<vmem>>, vector<1x1x8x128xf32>
    %46 = vector.shape_cast %45 : vector<1x1x8x128xf32> to vector<8x128xf32>
    %47 = vector.shape_cast %37 : vector<8x128xf32> to vector<1x1x8x128xf32>
    tpu.vector_store %arg3[%c0_8, %c0_9, %c0_10, %c0_11], %47 {strides = array<i32>} : memref<17x1x8x128xf32, #tpu.memory_space<vmem>>, vector<1x1x8x128xf32>,
    %c1_12 = arith.constant 1 : index
    %c0_13 = arith.constant 0 : index
    %c0_14 = arith.constant 0 : index
    %c0_15 = arith.constant 0 : index
    %48 = vector.load %arg3[%c1_12, %c0_13, %c0_14, %c0_15] : memref<17x1x8x128xf32, #tpu.memory_space<vmem>>, vector<1x1x8x128xf32>
    %49 = vector.shape_cast %48 : vector<1x1x8x128xf32> to vector<8x128xf32>
    %50 = vector.shape_cast %44 : vector<8x128xf32> to vector<1x1x8x128xf32>
    tpu.vector_store %arg3[%c1_12, %c0_13, %c0_14, %c0_15], %50 {strides = array<i32>} : memref<17x1x8x128xf32, #tpu.memory_space<vmem>>, vector<1x1x8x128xf32>,
    %51 = math.tanh %37 : vector<8x128xf32>
    %52 = math.tanh %44 : vector<8x128xf32>
    %c2_16 = arith.constant 2 : index
    %c0_17 = arith.constant 0 : index
    %c0_18 = arith.constant 0 : index
    %c0_19 = arith.constant 0 : index
    %53 = vector.load %arg3[%c2_16, %c0_17, %c0_18, %c0_19] : memref<17x1x8x128xf32, #tpu.memory_space<vmem>>, vector<1x1x8x128xf32>
    %54 = vector.shape_cast %53 : vector<1x1x8x128xf32> to vector<8x128xf32>
    %55 = vector.shape_cast %51 : vector<8x128xf32> to vector<1x1x8x128xf32>
    tpu.vector_store %arg3[%c2_16, %c0_17, %c0_18, %c0_19], %55 {strides = array<i32>} : memref<17x1x8x128xf32, #tpu.memory_space<vmem>>, vector<1x1x8x128xf32>,
    %c3_20 = arith.constant 3 : index
    %c0_21 = arith.constant 0 : index
    %c0_22 = arith.constant 0 : index
    %c0_23 = arith.constant 0 : index
    %56 = vector.load %arg3[%c3_20, %c0_21, %c0_22, %c0_23] : memref<17x1x8x128xf32, #tpu.memory_space<vmem>>, vector<1x1x8x128xf32>
    %57 = vector.shape_cast %56 : vector<1x1x8x128xf32> to vector<8x128xf32>
    %58 = vector.shape_cast %52 : vector<8x128xf32> to vector<1x1x8x128xf32>
    tpu.vector_store %arg3[%c3_20, %c0_21, %c0_22, %c0_23], %58 {strides = array<i32>} : memref<17x1x8x128xf32, #tpu.memory_space<vmem>>, vector<1x1x8x128xf32>,
    %59 = vector.broadcast %6 : f32 to vector<8x128xf32>
    %60 = arith.mulf %59, %51 : vector<8x128xf32>
    %61 = vector.broadcast %7 : f32 to vector<8x128xf32>
    %62 = arith.mulf %61, %52 : vector<8x128xf32>
    %63 = arith.addf %60, %62 : vector<8x128xf32>
    %64 = vector.broadcast %10 : f32 to vector<8x128xf32>
    %65 = arith.addf %63, %64 : vector<8x128xf32>
    %66 = vector.broadcast %8 : f32 to vector<8x128xf32>
    %67 = arith.mulf %66, %51 : vector<8x128xf32>
    %68 = vector.broadcast %9 : f32 to vector<8x128xf32>
    %69 = arith.mulf %68, %52 : vector<8x128xf32>
    %70 = arith.addf %67, %69 : vector<8x128xf32>
    %71 = vector.broadcast %11 : f32 to vector<8x128xf32>
    %72 = arith.addf %70, %71 : vector<8x128xf32>
    %c4_24 = arith.constant 4 : index
    %c0_25 = arith.constant 0 : index
    %c0_26 = arith.constant 0 : index
    %c0_27 = arith.constant 0 : index
    %73 = vector.load %arg3[%c4_24, %c0_25, %c0_26, %c0_27] : memref<17x1x8x128xf32, #tpu.memory_space<vmem>>, vector<1x1x8x128xf32>
    %74 = vector.shape_cast %73 : vector<1x1x8x128xf32> to vector<8x128xf32>
    %75 = vector.shape_cast %65 : vector<8x128xf32> to vector<1x1x8x128xf32>
    tpu.vector_store %arg3[%c4_24, %c0_25, %c0_26, %c0_27], %75 {strides = array<i32>} : memref<17x1x8x128xf32, #tpu.memory_space<vmem>>, vector<1x1x8x128xf32>,
    %c5_28 = arith.constant 5 : index
    %c0_29 = arith.constant 0 : index
    %c0_30 = arith.constant 0 : index
    %c0_31 = arith.constant 0 : index
    %76 = vector.load %arg3[%c5_28, %c0_29, %c0_30, %c0_31] : memref<17x1x8x128xf32, #tpu.memory_space<vmem>>, vector<1x1x8x128xf32>
    %77 = vector.shape_cast %76 : vector<1x1x8x128xf32> to vector<8x128xf32>
    %78 = vector.shape_cast %72 : vector<8x128xf32> to vector<1x1x8x128xf32>
    tpu.vector_store %arg3[%c5_28, %c0_29, %c0_30, %c0_31], %78 {strides = array<i32>} : memref<17x1x8x128xf32, #tpu.memory_space<vmem>>, vector<1x1x8x128xf32>,
    %79 = math.tanh %65 : vector<8x128xf32>
    %80 = math.tanh %72 : vector<8x128xf32>
    %c6_32 = arith.constant 6 : index
    %c0_33 = arith.constant 0 : index
    %c0_34 = arith.constant 0 : index
    %c0_35 = arith.constant 0 : index
    %81 = vector.load %arg3[%c6_32, %c0_33, %c0_34, %c0_35] : memref<17x1x8x128xf32, #tpu.memory_space<vmem>>, vector<1x1x8x128xf32>
    %82 = vector.shape_cast %81 : vector<1x1x8x128xf32> to vector<8x128xf32>
    %83 = vector.shape_cast %79 : vector<8x128xf32> to vector<1x1x8x128xf32>
    tpu.vector_store %arg3[%c6_32, %c0_33, %c0_34, %c0_35], %83 {strides = array<i32>} : memref<17x1x8x128xf32, #tpu.memory_space<vmem>>, vector<1x1x8x128xf32>,
    %c7_36 = arith.constant 7 : index
    %c0_37 = arith.constant 0 : index
    %c0_38 = arith.constant 0 : index
    %c0_39 = arith.constant 0 : index
    %84 = vector.load %arg3[%c7_36, %c0_37, %c0_38, %c0_39] : memref<17x1x8x128xf32, #tpu.memory_space<vmem>>, vector<1x1x8x128xf32>
    %85 = vector.shape_cast %84 : vector<1x1x8x128xf32> to vector<8x128xf32>
    %86 = vector.shape_cast %80 : vector<8x128xf32> to vector<1x1x8x128xf32>
    tpu.vector_store %arg3[%c7_36, %c0_37, %c0_38, %c0_39], %86 {strides = array<i32>} : memref<17x1x8x128xf32, #tpu.memory_space<vmem>>, vector<1x1x8x128xf32>,
    %87 = vector.broadcast %12 : f32 to vector<8x128xf32>
    %88 = arith.mulf %87, %79 : vector<8x128xf32>
    %89 = vector.broadcast %13 : f32 to vector<8x128xf32>
    %90 = arith.mulf %89, %80 : vector<8x128xf32>
    %91 = arith.addf %88, %90 : vector<8x128xf32>
    %92 = vector.broadcast %16 : f32 to vector<8x128xf32>
    %93 = arith.addf %91, %92 : vector<8x128xf32>
    %94 = vector.broadcast %14 : f32 to vector<8x128xf32>
    %95 = arith.mulf %94, %79 : vector<8x128xf32>
    %96 = vector.broadcast %15 : f32 to vector<8x128xf32>
    %97 = arith.mulf %96, %80 : vector<8x128xf32>
    %98 = arith.addf %95, %97 : vector<8x128xf32>
    %99 = vector.broadcast %17 : f32 to vector<8x128xf32>
    %100 = arith.addf %98, %99 : vector<8x128xf32>
    %c8_40 = arith.constant 8 : index
    %c0_41 = arith.constant 0 : index
    %c0_42 = arith.constant 0 : index
    %c0_43 = arith.constant 0 : index
    %101 = vector.load %arg3[%c8_40, %c0_41, %c0_42, %c0_43] : memref<17x1x8x128xf32, #tpu.memory_space<vmem>>, vector<1x1x8x128xf32>
    %102 = vector.shape_cast %101 : vector<1x1x8x128xf32> to vector<8x128xf32>
    %103 = vector.shape_cast %93 : vector<8x128xf32> to vector<1x1x8x128xf32>
    tpu.vector_store %arg3[%c8_40, %c0_41, %c0_42, %c0_43], %103 {strides = array<i32>} : memref<17x1x8x128xf32, #tpu.memory_space<vmem>>, vector<1x1x8x128xf32>,
    %c9_44 = arith.constant 9 : index
    %c0_45 = arith.constant 0 : index
    %c0_46 = arith.constant 0 : index
    %c0_47 = arith.constant 0 : index
    %104 = vector.load %arg3[%c9_44, %c0_45, %c0_46, %c0_47] : memref<17x1x8x128xf32, #tpu.memory_space<vmem>>, vector<1x1x8x128xf32>
    %105 = vector.shape_cast %104 : vector<1x1x8x128xf32> to vector<8x128xf32>
    %106 = vector.shape_cast %100 : vector<8x128xf32> to vector<1x1x8x128xf32>
    tpu.vector_store %arg3[%c9_44, %c0_45, %c0_46, %c0_47], %106 {strides = array<i32>} : memref<17x1x8x128xf32, #tpu.memory_space<vmem>>, vector<1x1x8x128xf32>,
    %107 = math.tanh %93 : vector<8x128xf32>
    %108 = math.tanh %100 : vector<8x128xf32>
    %c10_48 = arith.constant 10 : index
    %c0_49 = arith.constant 0 : index
    %c0_50 = arith.constant 0 : index
    %c0_51 = arith.constant 0 : index
    %109 = vector.load %arg3[%c10_48, %c0_49, %c0_50, %c0_51] : memref<17x1x8x128xf32, #tpu.memory_space<vmem>>, vector<1x1x8x128xf32>
    %110 = vector.shape_cast %109 : vector<1x1x8x128xf32> to vector<8x128xf32>
    %111 = vector.shape_cast %107 : vector<8x128xf32> to vector<1x1x8x128xf32>
    tpu.vector_store %arg3[%c10_48, %c0_49, %c0_50, %c0_51], %111 {strides = array<i32>} : memref<17x1x8x128xf32, #tpu.memory_space<vmem>>, vector<1x1x8x128xf32>,
    %c11_52 = arith.constant 11 : index
    %c0_53 = arith.constant 0 : index
    %c0_54 = arith.constant 0 : index
    %c0_55 = arith.constant 0 : index
    %112 = vector.load %arg3[%c11_52, %c0_53, %c0_54, %c0_55] : memref<17x1x8x128xf32, #tpu.memory_space<vmem>>, vector<1x1x8x128xf32>
    %113 = vector.shape_cast %112 : vector<1x1x8x128xf32> to vector<8x128xf32>
    %114 = vector.shape_cast %108 : vector<8x128xf32> to vector<1x1x8x128xf32>
    tpu.vector_store %arg3[%c11_52, %c0_53, %c0_54, %c0_55], %114 {strides = array<i32>} : memref<17x1x8x128xf32, #tpu.memory_space<vmem>>, vector<1x1x8x128xf32>,
    %115 = vector.broadcast %18 : f32 to vector<8x128xf32>
    %116 = arith.mulf %115, %107 : vector<8x128xf32>
    %117 = vector.broadcast %19 : f32 to vector<8x128xf32>
    %118 = arith.mulf %117, %108 : vector<8x128xf32>
    %119 = arith.addf %116, %118 : vector<8x128xf32>
    %120 = vector.broadcast %22 : f32 to vector<8x128xf32>
    %121 = arith.addf %119, %120 : vector<8x128xf32>
    %122 = vector.broadcast %20 : f32 to vector<8x128xf32>
    %123 = arith.mulf %122, %107 : vector<8x128xf32>
    %124 = vector.broadcast %21 : f32 to vector<8x128xf32>
    %125 = arith.mulf %124, %108 : vector<8x128xf32>
    %126 = arith.addf %123, %125 : vector<8x128xf32>
    %127 = vector.broadcast %23 : f32 to vector<8x128xf32>
    %128 = arith.addf %126, %127 : vector<8x128xf32>
    %c12_56 = arith.constant 12 : index
    %c0_57 = arith.constant 0 : index
    %c0_58 = arith.constant 0 : index
    %c0_59 = arith.constant 0 : index
    %129 = vector.load %arg3[%c12_56, %c0_57, %c0_58, %c0_59] : memref<17x1x8x128xf32, #tpu.memory_space<vmem>>, vector<1x1x8x128xf32>
    %130 = vector.shape_cast %129 : vector<1x1x8x128xf32> to vector<8x128xf32>
    %131 = vector.shape_cast %121 : vector<8x128xf32> to vector<1x1x8x128xf32>
    tpu.vector_store %arg3[%c12_56, %c0_57, %c0_58, %c0_59], %131 {strides = array<i32>} : memref<17x1x8x128xf32, #tpu.memory_space<vmem>>, vector<1x1x8x128xf32>,
    %c13_60 = arith.constant 13 : index
    %c0_61 = arith.constant 0 : index
    %c0_62 = arith.constant 0 : index
    %c0_63 = arith.constant 0 : index
    %132 = vector.load %arg3[%c13_60, %c0_61, %c0_62, %c0_63] : memref<17x1x8x128xf32, #tpu.memory_space<vmem>>, vector<1x1x8x128xf32>
    %133 = vector.shape_cast %132 : vector<1x1x8x128xf32> to vector<8x128xf32>
    %134 = vector.shape_cast %128 : vector<8x128xf32> to vector<1x1x8x128xf32>
    tpu.vector_store %arg3[%c13_60, %c0_61, %c0_62, %c0_63], %134 {strides = array<i32>} : memref<17x1x8x128xf32, #tpu.memory_space<vmem>>, vector<1x1x8x128xf32>,
    %135 = math.tanh %121 : vector<8x128xf32>
    %136 = math.tanh %128 : vector<8x128xf32>
    %c14_64 = arith.constant 14 : index
    %c0_65 = arith.constant 0 : index
    %c0_66 = arith.constant 0 : index
    %c0_67 = arith.constant 0 : index
    %137 = vector.load %arg3[%c14_64, %c0_65, %c0_66, %c0_67] : memref<17x1x8x128xf32, #tpu.memory_space<vmem>>, vector<1x1x8x128xf32>
    %138 = vector.shape_cast %137 : vector<1x1x8x128xf32> to vector<8x128xf32>
    %139 = vector.shape_cast %135 : vector<8x128xf32> to vector<1x1x8x128xf32>
    tpu.vector_store %arg3[%c14_64, %c0_65, %c0_66, %c0_67], %139 {strides = array<i32>} : memref<17x1x8x128xf32, #tpu.memory_space<vmem>>, vector<1x1x8x128xf32>,
    %c15_68 = arith.constant 15 : index
    %c0_69 = arith.constant 0 : index
    %c0_70 = arith.constant 0 : index
    %c0_71 = arith.constant 0 : index
    %140 = vector.load %arg3[%c15_68, %c0_69, %c0_70, %c0_71] : memref<17x1x8x128xf32, #tpu.memory_space<vmem>>, vector<1x1x8x128xf32>
    %141 = vector.shape_cast %140 : vector<1x1x8x128xf32> to vector<8x128xf32>
    %142 = vector.shape_cast %136 : vector<8x128xf32> to vector<1x1x8x128xf32>
    tpu.vector_store %arg3[%c15_68, %c0_69, %c0_70, %c0_71], %142 {strides = array<i32>} : memref<17x1x8x128xf32, #tpu.memory_space<vmem>>, vector<1x1x8x128xf32>,
    %143 = vector.broadcast %24 : f32 to vector<8x128xf32>
    %144 = arith.mulf %143, %135 : vector<8x128xf32>
    %145 = vector.broadcast %25 : f32 to vector<8x128xf32>
    %146 = arith.mulf %145, %136 : vector<8x128xf32>
    %147 = arith.addf %144, %146 : vector<8x128xf32>
    %148 = vector.broadcast %26 : f32 to vector<8x128xf32>
    %149 = arith.addf %147, %148 : vector<8x128xf32>
    %c16_72 = arith.constant 16 : index
    %c0_73 = arith.constant 0 : index
    %c0_74 = arith.constant 0 : index
    %c0_75 = arith.constant 0 : index
    %150 = vector.load %arg3[%c16_72, %c0_73, %c0_74, %c0_75] : memref<17x1x8x128xf32, #tpu.memory_space<vmem>>, vector<1x1x8x128xf32>
    %151 = vector.shape_cast %150 : vector<1x1x8x128xf32> to vector<8x128xf32>
    %152 = vector.shape_cast %149 : vector<8x128xf32> to vector<1x1x8x128xf32>
    tpu.vector_store %arg3[%c16_72, %c0_73, %c0_74, %c0_75], %152 {strides = array<i32>} : memref<17x1x8x128xf32, #tpu.memory_space<vmem>>, vector<1x1x8x128xf32>,
    return
  }
  func.func @transform_0(%arg0: i32, %arg1: memref<27xf32, #tpu.memory_space<smem>>) -> (i32, i32, i32, i32) {
    %c0_i32 = arith.constant 0 : i32
    %c0_i32_0 = arith.constant 0 : i32
    %c0_i32_1 = arith.constant 0 : i32
    %c0_i32_2 = arith.constant 0 : i32
    return %c0_i32, %arg0, %c0_i32_0, %c0_i32_1 : i32, i32, i32, i32
  }
  func.func @transform_1(%arg0: i32, %arg1: memref<27xf32, #tpu.memory_space<smem>>) -> (i32, i32, i32, i32) {
    %c0_i32 = arith.constant 0 : i32
    %c0_i32_0 = arith.constant 0 : i32
    %c0_i32_1 = arith.constant 0 : i32
    %c0_i32_2 = arith.constant 0 : i32
    return %c0_i32, %arg0, %c0_i32_0, %c0_i32_1 : i32, i32, i32, i32
  }
}

</mosaic_0001>

<bundles_post_ra>
// kernel: tpu_custom_call.1
= control target key start
LH: loop header
LB: loop body
LE: loop exit
PB: predicated region body
PF: predicated region fallthrough
CT: control target
= control target key end

     0   :  { %s813_s0 = inlined_call_operand.hbm [shape: f32[27], index: 0, kind: input, shape index: {}]   ;;  %s814_s1 = inlined_call_operand.hbm [shape: f32[2,2,8,128], index: 1, kind: input, shape index: {}]   ;;  %s815_s2 = inlined_call_operand.hbm [shape: f32[17,2,8,128], index: 2, kind: output, shape index: {}]  }
   0x1   :  { %s482_s11 = scalar_lea.hbm %s813_s0, 16 }
   0x2   :  { %p483_p0 = scmp.ne.s32.totalorder %s813_s0, %s482_s11  ;;  %p486_p1 = scmp.lt.u32.totalorder %s482_s11, %s813_s0 }
   0x4   :  { %p488_p2 = pnand %p486_p1, %p483_p0 }
   0x6   :  { %491 = shalt.err (!%p488_p2)  }
   0x7   :  { %s592_s16 = smov [#allocation3]  }
   0x8   :  { %8 = dma.hbm_to_smem %s813_s0, 16, %s592_s16, [#allocation2] }
   0x9   :  { %566 = dma.done.wait [#allocation2], 16 }
   0xa   :  { %567 = vsyncadd [#allocation2], 4294967280 }
   0xb   :  { %10 = sfence }
   0xc   :  { %11 = vsyncpa [#allocation5], 0 }
   0xd   :  { %13 = vsyncpa [#allocation5 + $0x1], 0 }
   0xe   :  { %14 = vsyncpa [#allocation6], 0 }
   0xf   :  { %16 = vsyncpa [#allocation6 + $0x1], 0  ;;  %s628_s19 = smov 0   ;;  %s630_s20 = smov 0  }
  0x10   :  { %s632_s21 = smov 0   ;;  %s634_s22 = smov 0  }
  0x11 LB: > { %s649_s0 = sadd.s32 4294967295, %s590_s22   ;;  %s359_s23 = sadd.s32 4294967294, %s590_s22   ;;  %s590_s22 = sphi %s634_s22, %s829_s22   ;;  %s586_s21 = sphi %s632_s21, %s828_s21   ;;  %s582_s20 = sphi %s630_s20, %s827_s20   ;;  %s578_s19 = sphi %s628_s19, %s826_s19  }
  0x12   : > { %s653_s24 = sadd.s32 1, %s590_s22   ;;  %s29_s25 = sadd.s32 1, %s586_s21 }
  0x13   : > { %s26_s26 = ssub.s32 %s590_s22, %s653_s24  ;;  %p36_p3 = scmp.ne.s32.totalorder %s586_s21, %s582_s20 }
  0x14   : > { %p27_p4 = scmp.eq.s32.totalorder %s26_s26, 0  ;;  %p37_p5 = scmp.eq.s32.totalorder %s590_s22, 0 }
  0x15   : > { %p42_p6 = scmp.ne.s32.totalorder %s582_s20, %s578_s19  ;;  %p43_p7 = scmp.eq.s32.totalorder %s649_s0, 0 }
  0x16   : > { %s665_s27 = scalar_select %p27_p4, %s586_s21, %s29_s25  }
  0x17   : > { %p667_p8 = por %p37_p5, %p36_p3  ;;  %p671_p9 = por %p43_p7, %p42_p6 }
  0x18   : > { %p66_p10 = scmp.eq.s32.totalorder %s649_s0, 1  ;;  %p72_p11 = scmp.eq.s32.totalorder %s359_s23, 1 }
  0x19   : > { %p425_p13 = scmp.lt.s32.totalorder %s590_s22, 2  ;;  %s92_s4 = sand.u32 1, %s586_s21  }
  0x1a   : > { %p678_p0 = por %p66_p10, %p36_p3  ;;  %p682_p1 = por %p72_p11, %p42_p6 }
  0x1b   : > { %s363_s5 = sshll.u32 %s590_s22, 7  ;;  %s362_s6 = sshll.u32 %s92_s4, 4 }
  0x1c   : > { %s819_s30 = scalar_select %p678_p0, 1, 0 }
  0x1d   : > { %s820_s3 = scalar_select %p682_p1, 1, 0 }
  0x1e   : > { %s691_s9 = scalar_lea.hbm %s814_s1, %s363_s5  ;;  %s96_s10 = scalar_lea.vmem [#allocation4], %s362_s6 }
  0x1f   : > { %s102_s11 = sshll.u32 %s96_s10, 4  ;;  %p695_p2 = pnand %p425_p13, %p667_p8  ;;  %s699_s11 = int_to_ptr.vmem [resolvable:$true] %s102_s11 }
  0x20   : > { %s702_s13 = scalar_lea.sflag [#allocation5], %s92_s4  ;;  %s492_s14 = scalar_lea.hbm %s691_s9, 256 }
  0x21   : > { %p493_p4 = scmp.ne.s32.totalorder %s691_s9, %s492_s14  ;;  %p494_p5 = pneg %p695_p2 }
  0x22   : > { %s497_s17 = scalar_lea.hbm %s814_s1, 512  ;;  %p498_p8 = scmp.lt.u32.totalorder %s691_s9, %s814_s1 }
  0x23   : > { %p495_p6 = pnand %p494_p5, %p493_p4  ;;  %p499_p10 = scmp.lt.u32.totalorder %s497_s17, %s492_s14 }
  0x24   : > { %p501_p13 = scmp.lt.u32.totalorder %s492_s14, %s691_s9 }
  0x25   : > { %p496_p7 = pneg %p495_p6  ;;  %p500_p11 = por %p499_p10, %p498_p8 }
  0x27   : > { %p502_p12 = por %p501_p13, %p500_p11 }
  0x29   : > { %p503_p3 = pnand %p502_p12, %p496_p7 }
  0x2b   : > { %506 = shalt.err (!%p503_p3)
}
  0x2c   : > { %s507_s25 = scalar_lea.vmem %s699_s11, 256  ;;  %s593_s26 = smov [#allocation4]  }
  0x2d   : > { %p508_p4 = scmp.ne.s32.totalorder %s699_s11, %s507_s25  ;;  %s512_s28 = sshll.u32 %s593_s26, 4  ;;  %s513_s28 = int_to_ptr.vmem [resolvable:$false] %s512_s28 }
  0x2e   : > { %s514_s4 = scalar_lea.vmem %s513_s28, 512  ;;  %p515_p0 = scmp.lt.s32.totalorder %s699_s11, %s513_s28 }
  0x2f   : > { %p510_p6 = pnand %p508_p4, %p494_p5  ;;  %p516_p8 = scmp.lt.s32.totalorder %s514_s4, %s507_s25 }
  0x31   : > { %p511_p1 = pneg %p510_p6  ;;  %p517_p10 = por %p516_p8, %p515_p0 }
  0x33   : > { %p518_p11 = pnand %p517_p10, %p511_p1 }
  0x35   : > { %521 = shalt.err (!%p518_p11)
}
  0x36   : > { %s594_s5 = smov 256   ;;  %s595_s6 = smov 128  }
  0x37   : > { %s596_s7 = smov 8   ;;  %p110_p12 = scmp.lt.s32.totalorder %s590_s22, 3 }
  0x38   : > { %420 = dma.hbm_to_vmem [thread:$0]  (!%p695_p2), %s691_s9, 256, %s699_s11, %s702_s13, %s594_s5, %s595_s6, %s596_s7  }
  0x39   : > { %p822_p3 = scmp.ge.s32.totalorder %s590_s22, 1 }
  0x3b   : > { %p111_p5 = pnand %p822_p3, %p110_p12 }
  0x3c   : > { %s734_s8 = sand.u32 (!%p111_p5), 1, %s582_s20  }
  0x3d   : > { %114 = sbr.rel (%p111_p5) target bundleno = 171 (0xab), region = 24  ;;  %s365_s10 = sshll.u32 (!%p111_p5), %s734_s8, 4 }
  0x3e   : > { %s117_s14 = scalar_lea.sflag (!%p111_p5), [#allocation5], %s734_s8  ;;  %s120_s15 = scalar_lea.vmem (!%p111_p5), [#allocation4], %s365_s10 }
  0x44   : > { %569 = dma.done.wait (%p671_p9), %s117_s14, 256  }
  0x45   : > { %571 = vsyncadd (%p671_p9), %s117_s14, 4294967040  ;;  %s139_s9 = sld [smem:[#allocation3]]  ;;  %s366_s11 = sld [smem:[#allocation3 + $0x1]]  ;;  %v166_v0 = vld [vmem:[%s120_s15] sm:$0xff]  ;;  %v392_v1 = vld [vmem:[%s120_s15 + $0x8] sm:$0xff] }
  0x46   : > { %s369_s12 = sld [smem:[#allocation3 + $0x4]]  ;;  %s367_s13 = sld [smem:[#allocation3 + $0x2]] }
  0x47   : > { %s368_s16 = sld [smem:[#allocation3 + $0x3]]  ;;  %s370_s17 = sld [smem:[#allocation3 + $0x5]] }
  0x48   : > { %s412_s18 = smul.u32 136, %s734_s8  ;;  %s371_s23 = sld [smem:[#allocation3 + $0x6]] }
  0x49   : > { %s373_s25 = sld [smem:[#allocation3 + $0x8]]  ;;  %s372_s26 = sld [smem:[#allocation3 + $0x7]] }
  0x4a   : > { %s743_s29 = scalar_lea.vmem [#allocation7], %s412_s18  ;;  %s374_s28 = sld [smem:[#allocation3 + $0x9]] }
  0x4b   : > { %v169_v2 = vstv %s139_s9  ;;  %v171_v3 = vstv %s366_s11  ;;  %s375_s4 = sld [smem:[#allocation3 + $0xa]]  ;;  %s376_s5 = sld [smem:[#allocation3 + $0xb]] }
  0x4c   : > { %v170_v4 = vmul.f32 %v169_v2, %v166_v0  ;;  %v172_v5 = vmul.f32 %v392_v1, %v171_v3  ;;  %v174_v6 = vstv %s369_s12  ;;  %v176_v7 = vstv %s367_s13  ;;  %s377_s6 = sld [smem:[#allocation3 + $0xc]]  ;;  %s379_s7 = sld [smem:[#allocation3 + $0xe]] }
  0x4d   : > { %v178_v8 = vstv %s368_s16  ;;  %v177_v10 = vmul.f32 %v176_v7, %v166_v0  ;;  %v181_v12 = vstv %s370_s17  ;;  %s378_s10 = sld [smem:[#allocation3 + $0xd]]  ;;  %s380_s14 = sld [smem:[#allocation3 + $0xf]] }
  0x4e   : > { %v173_v9 = vadd.f32 %v172_v5, %v170_v4  ;;  %v179_v11 = vmul.f32 %v392_v1, %v178_v8  ;;  %v192_v16 = vstv %s371_s23  ;;  %s381_s15 = sld [smem:[#allocation3 + $0x10]]  ;;  %s382_s9 = sld [smem:[#allocation3 + $0x11]] }
  0x4f   : > { %v199_v17 = vstv %s373_s25  ;;  %v194_v19 = vstv %s372_s26  ;;  %s383_s11 = sld [smem:[#allocation3 + $0x12]]  ;;  %s385_s12 = sld [smem:[#allocation3 + $0x14]] }
  0x50   : > { %v175_v13 = vadd.f32 %v174_v6, %v173_v9  ;;  %v180_v14 = vadd.f32 %v179_v11, %v177_v10  ;;  %v201_v20 = vstv %s374_s28  ;;  %s384_s13 = sld [smem:[#allocation3 + $0x13]]  ;;  %s386_s16 = sld [smem:[#allocation3 + $0x15]] }
  0x51   : > { %v197_v26 = vstv %s375_s4  ;;  %v204_v27 = vstv %s376_s5  ;;  %s387_s17 = sld [smem:[#allocation3 + $0x16]]  ;;  %s388_s18 = sld [smem:[#allocation3 + $0x17]] }
  0x52   : > { %183 = vst [vmem:[%s743_s29] sm:$0xff] %v175_v13  ;;  %466 = vtanh.f32 %v175_v13  ;;  %v182_v15 = vadd.f32 %v181_v12, %v180_v14  ;;  %v216_v32 = vstv %s377_s6  ;;  %v223_v33 = vstv %s379_s7  ;;  %s389_s23 = sld [smem:[#allocation3 + $0x18]]  ;;  %s390_s25 = sld [smem:[#allocation3 + $0x19]] }
  0x53   : > { %v218_v34 = vstv %s378_s10  ;;  %v225_v35 = vstv %s380_s14  ;;  %s391_s26 = sld [smem:[#allocation3 + $0x1a]]  ;;  %s409_s28 = sshll.u32 %s649_s0, 7 }
  0x54   : > { %393 = vst [vmem:[%s743_s29 + $0x8] sm:$0xff] %v182_v15  ;;  %468 = vtanh.f32 %v182_v15  ;;  %v221_v42 = vstv %s381_s15  ;;  %v228_v43 = vstv %s382_s9  ;;  %s286_s4 = sshll.u32 %s743_s29, 4  ;;  %s766_s7 = scalar_lea.hbm %s815_s2, %s409_s28  ;;  %s768_s4 = int_to_ptr.vmem [resolvable:$true] %s286_s4 }
  0x55   : > { %v240_v48 = vstv %s383_s11  ;;  %v247_v49 = vstv %s385_s12  ;;  %s274_s10 = scalar_lea.sflag [#allocation6], %s734_s8  ;;  %s522_s14 = scalar_lea.vmem %s768_s4, 2176 }
  0x56   : > { %v242_v50 = vstv %s384_s13  ;;  %v249_v51 = vstv %s386_s16  ;;  %p523_p9 = scmp.ne.s32.totalorder %s768_s4, %s522_s14  ;;  %p823_p0 = scmp.ne.s32.totalorder %s819_s30, 0 }
  0x57   : > { %v245_v58 = vstv %s387_s17  ;;  %v252_v59 = vstv %s388_s18  ;;  %s597_s0 = smov [#allocation7]  }
  0x58   : > { %v264_v0 = vstv %s389_s23  ;;  %v266_v1 = vstv %s390_s25  ;;  %p524_p1 = pnand %p523_p9, %p823_p0  ;;  %s526_s15 = sshll.u32 %s597_s0, 4  ;;  %s527_s15 = int_to_ptr.vmem [resolvable:$false] %s526_s15 }
  0x59   : > { %v269_v6 = vstv %s391_s26  ;;  %s528_s9 = scalar_lea.vmem %s527_s15, 4352  ;;  %p529_p7 = scmp.lt.s32.totalorder %s768_s4, %s527_s15 }
  0x5a   : > { %p525_p2 = pneg %p524_p1  ;;  %p530_p13 = scmp.lt.s32.totalorder %s528_s9, %s522_s14 }
  0x5c   : > { %v467_v18 = vpop.eup %466  ;;  %p531_p4 = por %p530_p13, %p529_p7 }
  0x5d   : > { %394 = vst [vmem:[%s743_s29 + $0x10] sm:$0xff] %v467_v18  ;;  %v193_v21 = vmul.f32 %v467_v18, %v192_v16  ;;  %v200_v22 = vmul.f32 %v467_v18, %v199_v17 }
  0x5e   : > { %v469_v23 = vpop.eup %468  ;;  %p532_p6 = pnand %p531_p4, %p525_p2 }
  0x5f   : > { %395 = vst [vmem:[%s743_s29 + $0x18] sm:$0xff] %v469_v23  ;;  %v195_v24 = vmul.f32 %v469_v23, %v194_v19  ;;  %v202_v25 = vmul.f32 %v469_v23, %v201_v20 }
  0x61   : > { %v196_v28 = vadd.f32 %v195_v24, %v193_v21  ;;  %v203_v29 = vadd.f32 %v202_v25, %v200_v22 }
  0x63   : > { %v198_v30 = vadd.f32 %v197_v26, %v196_v28  ;;  %v205_v31 = vadd.f32 %v204_v27, %v203_v29 }
  0x65   : > { %396 = vst [vmem:[%s743_s29 + $0x20] sm:$0xff] %v198_v30  ;;  %470 = vtanh.f32 %v198_v30  ;;  %397 = vst [vmem:[%s743_s29 + $0x28] sm:$0xff] %v205_v31 }
  0x66   : > { %472 = vtanh.f32 %v205_v31 }
  0x6f   : > { %v471_v36 = vpop.eup %470 }
  0x70   : > { %v473_v37 = vpop.eup %472  ;;  %398 = vst [vmem:[%s743_s29 + $0x30] sm:$0xff] %v471_v36  ;;  %v217_v38 = vmul.f32 %v471_v36, %v216_v32  ;;  %v224_v39 = vmul.f32 %v471_v36, %v223_v33 }
  0x71   : > { %399 = vst [vmem:[%s743_s29 + $0x38] sm:$0xff] %v473_v37  ;;  %v219_v40 = vmul.f32 %v473_v37, %v218_v34  ;;  %v226_v41 = vmul.f32 %v473_v37, %v225_v35 }
  0x73   : > { %v220_v44 = vadd.f32 %v219_v40, %v217_v38  ;;  %v227_v45 = vadd.f32 %v226_v41, %v224_v39 }
  0x75   : > { %v222_v46 = vadd.f32 %v221_v42, %v220_v44  ;;  %v229_v47 = vadd.f32 %v228_v43, %v227_v45 }
  0x77   : > { %400 = vst [vmem:[%s743_s29 + $0x40] sm:$0xff] %v222_v46  ;;  %474 = vtanh.f32 %v222_v46  ;;  %401 = vst [vmem:[%s743_s29 + $0x48] sm:$0xff] %v229_v47 }
  0x78   : > { %476 = vtanh.f32 %v229_v47 }
  0x81   : > { %v475_v52 = vpop.eup %474 }
  0x82   : > { %v477_v53 = vpop.eup %476  ;;  %402 = vst [vmem:[%s743_s29 + $0x50] sm:$0xff] %v475_v52  ;;  %v241_v54 = vmul.f32 %v475_v52, %v240_v48  ;;  %v248_v55 = vmul.f32 %v475_v52, %v247_v49 }
  0x83   : > { %403 = vst [vmem:[%s743_s29 + $0x58] sm:$0xff] %v477_v53  ;;  %v243_v56 = vmul.f32 %v477_v53, %v242_v50  ;;  %v250_v57 = vmul.f32 %v477_v53, %v249_v51 }
  0x85   : > { %v244_v60 = vadd.f32 %v243_v56, %v241_v54  ;;  %v251_v61 = vadd.f32 %v250_v57, %v248_v55 }
  0x87   : > { %v246_v62 = vadd.f32 %v245_v58, %v244_v60  ;;  %v253_v63 = vadd.f32 %v252_v59, %v251_v61 }
  0x89   : > { %404 = vst [vmem:[%s743_s29 + $0x60] sm:$0xff] %v246_v62  ;;  %478 = vtanh.f32 %v246_v62  ;;  %405 = vst [vmem:[%s743_s29 + $0x68] sm:$0xff] %v253_v63 }
  0x8a   : > { %480 = vtanh.f32 %v253_v63 }
  0x93   : > { %v479_v2 = vpop.eup %478 }
  0x94   : > { %v481_v3 = vpop.eup %480  ;;  %406 = vst [vmem:[%s743_s29 + $0x70] sm:$0xff] %v479_v2  ;;  %v265_v4 = vmul.f32 %v479_v2, %v264_v0 }
  0x95   : > { %407 = vst [vmem:[%s743_s29 + $0x78] sm:$0xff] %v481_v3  ;;  %v267_v5 = vmul.f32 %v481_v3, %v266_v1 }
  0x97   : > { %v268_v7 = vadd.f32 %v267_v5, %v265_v4 }
  0x99   : > { %v270_v8 = vadd.f32 %v269_v6, %v268_v7 }
  0x9b   : > { %408 = vst [vmem:[%s743_s29 + $0x80] sm:$0xff] %v270_v8 }
  0x9c   : > { %535 = shalt.err (!%p532_p6)
}
  0x9d   : > { %s536_s29 = scalar_lea.hbm %s766_s7, 2176  ;;  %s540_s13 = scalar_lea.hbm %s815_s2, 4352 }
  0x9e   : > { %p537_p8 = scmp.ne.s32.totalorder %s766_s7, %s536_s29  ;;  %p541_p12 = scmp.lt.u32.totalorder %s766_s7, %s815_s2 }
  0x9f   : > { %p542_p3 = scmp.lt.u32.totalorder %s540_s13, %s536_s29  ;;  %p544_p9 = scmp.lt.u32.totalorder %s536_s29, %s766_s7 }
  0xa0   : > { %p538_p10 = pnand %p537_p8, %p823_p0 }
  0xa1   : > { %p543_p5 = por %p542_p3, %p541_p12 }
  0xa2   : > { %p539_p11 = pneg %p538_p10 }
  0xa3   : > { %p545_p1 = por %p544_p9, %p543_p5 }
  0xa5   : > { %p546_p2 = pnand %p545_p1, %p539_p11 }
  0xa7   : > { %549 = shalt.err (!%p546_p2)
}
  0xa8   : > { %s598_s18 = smov 128   ;;  %s599_s23 = smov 256  }
  0xa9   : > { %s600_s25 = smov 8  }
  0xaa   : > { %415 = dma.vmem_to_hbm [thread:$0]  (%p823_p0), %s768_s4, 2176, %s766_s7, %s274_s10, %s598_s18, %s599_s23, %s600_s25  }
  0xab PF: > { %s301_s26 = sand.u32 1, %s578_s19   ;;  %p824_p7 = scmp.ne.s32.totalorder %s820_s3, 0 }
  0xac   : > { %p825_p13 = scmp.ge.s32.totalorder %s590_s22, 2  ;;  %s302_s28 = scalar_lea.sflag [#allocation6], %s301_s26 }
  0xae   : > { %p422_p4 = pnand %p825_p13, %p824_p7 }
  0xb0   : > { %573 = dma.done.wait (!%p422_p4), %s302_s28, 2176  }
  0xb1   : > { %575 = vsyncadd (!%p422_p4), %s302_s28, 4294965120  ;;  %p19_p6 = scmp.ge.s32.totalorder %s653_s24, 4   ;;  %s826_s19 = smov %s582_s20 }
  0xb2   : > { %s827_s20 = smov %s586_s21  ;;  %s828_s21 = smov %s665_s27 }
  0xb3   : > { %s829_s22 = smov %s653_s24  ;;  %21 = sbr.rel (!%p19_p6) target bundleno = 17 (0x11), region = 86 }
  0xba   :  { %307 = vsyncpa [#allocation5], 1 }
  0xbb   :  { %309 = vsyncpa [#allocation5 + $0x1], 1 }
  0xbc   :  { %310 = vsyncpa [#allocation6], 1 }
  0xbd   :  { %312 = vsyncpa [#allocation6 + $0x1], 1 }

</bundles_post_ra>
